<compile_context>
chip_gen: v5e
topology: v5e:2x2
jax: 0.10.0
libtpu: 0.0.40
codegen_flags: <defaults>
</compile_context>

<pallas_src>
import functools

import jax
import jax.numpy as jnp
from jax.experimental import pallas as pl
from jax.experimental.pallas import tpu as pltpu


def _round_up(n, m):
    return ((n + m - 1) // m) * m


def _pad2d(a, rows, cols):
    r, c = a.shape
    return jnp.pad(a, ((0, rows - r), (0, cols - c)))


def mlp_kernel(x_ref, w1_ref, b1_ref, w2_ref, b2_ref, w3_ref, b3_ref, o_ref,
               *, valid_out):
    # x streams in as f32 (no separate wrapper cast pass over HBM); cast to the MXU
    # compute dtype here — the VPU cast hides under the DMA / matmuls.
    x = x_ref[...].astype(w1_ref.dtype)                                  # (TB, 784)

    # fc1 + ReLU  (bf16 MXU inputs, f32 accumulation)
    h1 = jnp.dot(x, w1_ref[...], preferred_element_type=jnp.float32) + b1_ref[...]
    h1 = jnp.maximum(h1, 0.0).astype(w2_ref.dtype)                       # (TB, 128)

    # fc2 + ReLU
    h2 = jnp.dot(h1, w2_ref[...], preferred_element_type=jnp.float32) + b2_ref[...]
    h2 = jnp.maximum(h2, 0.0).astype(w3_ref.dtype)                       # (TB, 128)

    # fc3 (output padded to 128 lanes for a lane-dense store)
    logits = jnp.dot(h2, w3_ref[...], preferred_element_type=jnp.float32) + b3_ref[...]

    # Mask the padded lanes so they contribute nothing to the log-sum-exp.
    lane = jax.lax.broadcasted_iota(jnp.int32, logits.shape, 1)
    logits = jnp.where(lane < valid_out, logits, jnp.float32(-1e30))

    # Numerically stable log_softmax along the last axis (EUP/XLU epilogue — free filler
    # next to the MXU/DMA work).
    m = jnp.max(logits, axis=-1, keepdims=True)
    shifted = logits - m
    lse = jnp.log(jnp.sum(jnp.exp(shifted), axis=-1, keepdims=True))
    o_ref[...] = (shifted - lse).astype(o_ref.dtype)


def prepare_params(w1, b1, w2, b2, w3, b3, *, compute_dtype=jnp.bfloat16):
    """One-time weight prep: pad to lane-dense dims + cast. Call once, reuse per forward."""
    in_sz = w1.shape[0]
    h1_p = _round_up(w1.shape[1], 128)
    h2_p = _round_up(w2.shape[1], 128)
    out_sz = w3.shape[1]
    out_p = _round_up(out_sz, 128)

    w1p = _pad2d(w1, in_sz, h1_p).astype(compute_dtype)
    b1p = _pad2d(b1.reshape(1, -1), 1, h1_p).astype(jnp.float32)
    w2p = _pad2d(w2, h1_p, h2_p).astype(compute_dtype)
    b2p = _pad2d(b2.reshape(1, -1), 1, h2_p).astype(jnp.float32)
    w3p = _pad2d(w3, h2_p, out_p).astype(compute_dtype)
    b3p = _pad2d(b3.reshape(1, -1), 1, out_p).astype(jnp.float32)
    return (w1p, b1p, w2p, b2p, w3p, b3p), out_sz


def mlp_forward(x, prepared, out_sz, *, tb=2048):
    """y = log_softmax(relu(relu(x@w1+b1)@w2+b2)@w3+b3).

    `prepared` comes from prepare_params(); weights are stored (in, out) so the kernel
    computes y = x @ W + b directly on the MXU.
    """
    w1p, b1p, w2p, b2p, w3p, b3p = prepared
    B, in_sz = x.shape
    h1_p = w1p.shape[1]
    h2_p = w2p.shape[1]
    out_p = w3p.shape[1]

    # Batch tile: multiple of 8 sublanes (or the full batch when B <= 8), capped at `tb`
    # and at round_up(ceil(B/2), 8) so the grid has >= 2 steps for v7x's two TensorCores.
    if B <= 8:
        TB = B
    else:
        TB = min(tb, _round_up(pl.cdiv(B, 2), 8))
    grid = (pl.cdiv(B, TB),)  # ragged last block OK: row-wise math, OOB writes are dropped

    resident = lambda i: (0, 0)  # same block every step -> weights stay resident in VMEM

    out_padded = pl.pallas_call(
        functools.partial(mlp_kernel, valid_out=out_sz),
        out_shape=jax.ShapeDtypeStruct((B, out_p), jnp.bfloat16),
        grid=grid,
        in_specs=[
            pl.BlockSpec((TB, in_sz), lambda i: (i, 0)),   # x (f32): tiled over batch
            pl.BlockSpec((in_sz, h1_p), resident),          # w1
            pl.BlockSpec((1, h1_p), resident),              # b1
            pl.BlockSpec((h1_p, h2_p), resident),           # w2
            pl.BlockSpec((1, h2_p), resident),              # b2
            pl.BlockSpec((h2_p, out_p), resident),          # w3
            pl.BlockSpec((1, out_p), resident),             # b3
        ],
        out_specs=pl.BlockSpec((TB, out_p), lambda i: (i, 0)),
        compiler_params=pltpu.CompilerParams(
            dimension_semantics=("parallel",),
            # 48 MiB: raises v5e's 16 MiB scoped default, stays under v7x's 64 MiB physical.
            vmem_limit_bytes=48 * 1024 * 1024,
        ),
    )(x, w1p, b1p, w2p, b2p, w3p, b3p)

    # Tiny (B, out_sz) slice; return f32 like the reference module.
    # TODO(synk): fuse the downstream consumer (NLL loss / argmax) into the epilogue to
    # avoid storing the 128-lane padded slab entirely.
    return out_padded[:, :out_sz].astype(jnp.float32)


def init_params(key, in_sz=784, out_sz=10, layers=(120, 84)):
    """Deterministic synthetic init (PyTorch-Linear-like uniform fan-in scaling)."""
    dims = [in_sz, layers[0], layers[1], out_sz]
    params = []
    for i in range(3):
        fan_in, fan_out = dims[i], dims[i + 1]
        key, kw, kb = jax.random.split(key, 3)
        bound = 1.0 / jnp.sqrt(jnp.float32(fan_in))
        w = jax.random.uniform(kw, (fan_in, fan_out), jnp.float32, -bound, bound)
        b = jax.random.uniform(kb, (1, fan_out), jnp.float32, -bound, bound)
        params += [w, b]
    return params


if __name__ == "__main__":
    key = jax.random.PRNGKey(0)
    key, kx = jax.random.split(key)

    in_sz, n_classes = 784, 10
    w1, b1, w2, b2, w3, b3 = init_params(key, in_sz=in_sz, out_sz=n_classes, layers=(120, 84))

    # One-time weight prep (hoisted out of the per-call path).
    prepared, out_sz = prepare_params(w1, b1, w2, b2, w3, b3)

    def ref_fn(x):
        h1 = jnp.maximum(x @ w1 + b1, 0.0)
        h2 = jnp.maximum(h1 @ w2 + b2, 0.0)
        return jax.nn.log_softmax(h2 @ w3 + b3, axis=1)

    # batch=8 exercises the single-tile path; batch=13 exercises the ragged last block
    # (B % TB != 0, no wrapper padding of x).
    for batch in (8, 13):
        kx_b = jax.random.fold_in(kx, batch)
        x = jax.random.normal(kx_b, (batch, in_sz), jnp.float32)

        out = mlp_forward(x, prepared, out_sz)
        jax.block_until_ready(out)

        ref = ref_fn(x)
        assert out.shape == (batch, n_classes)
        # Tolerance relaxed because the kernel uses bf16 MXU inputs (f32 accumulation)
        # and a bf16 output store.
        assert jnp.allclose(out, ref, atol=5e-2, rtol=5e-2), float(jnp.max(jnp.abs(out - ref)))

    print("KERNEL_OK")
</pallas_src>

<mosaic_0001>
module attributes {stable_mosaic.version = 11 : i64} {
  func.func @mlp_kernel(%arg0: i32, %arg1: memref<8x784xf32, #tpu.memory_space<vmem>>, %arg2: memref<784x128xbf16, #tpu.memory_space<vmem>>, %arg3: memref<1x128xf32, #tpu.memory_space<vmem>>, %arg4: memref<128x128xbf16, #tpu.memory_space<vmem>>, %arg5: memref<1x128xf32, #tpu.memory_space<vmem>>, %arg6: memref<128x128xbf16, #tpu.memory_space<vmem>>, %arg7: memref<1x128xf32, #tpu.memory_space<vmem>>, %arg8: memref<8x128xbf16, #tpu.memory_space<vmem>>) attributes {dimension_semantics = [#tpu.dimension_semantics<parallel>], iteration_bounds = array<i64: 1>, scalar_prefetch = 0 : i64, scratch_operands = 0 : i64, tpu.core_type = #tpu.core_type<tc>, window_params = [{transform_indices = @transform_0, window_bounds = array<i64: 8, 784>}, {pipeline_mode = #tpu.pipeline_mode<synchronous>, transform_indices = @transform_1, window_bounds = array<i64: 784, 128>}, {pipeline_mode = #tpu.pipeline_mode<synchronous>, transform_indices = @transform_2, window_bounds = array<i64: 1, 128>}, {pipeline_mode = #tpu.pipeline_mode<synchronous>, transform_indices = @transform_3, window_bounds = array<i64: 128, 128>}, {pipeline_mode = #tpu.pipeline_mode<synchronous>, transform_indices = @transform_4, window_bounds = array<i64: 1, 128>}, {pipeline_mode = #tpu.pipeline_mode<synchronous>, transform_indices = @transform_5, window_bounds = array<i64: 128, 128>}, {pipeline_mode = #tpu.pipeline_mode<synchronous>, transform_indices = @transform_6, window_bounds = array<i64: 1, 128>}, {transform_indices = @transform_7, window_bounds = array<i64: 8, 128>}]} {
    %c0 = arith.constant 0 : index
    %c0_0 = arith.constant 0 : index
    %0 = vector.load %arg1[%c0, %c0_0] : memref<8x784xf32, #tpu.memory_space<vmem>>, vector<8x784xf32>
    %1 = arith.truncf %0 : vector<8x784xf32> to vector<8x784xbf16>
    %c0_1 = arith.constant 0 : index
    %c0_2 = arith.constant 0 : index
    %2 = vector.load %arg2[%c0_1, %c0_2] : memref<784x128xbf16, #tpu.memory_space<vmem>>, vector<784x128xbf16>
    %cst = arith.constant dense<0.000000e+00> : vector<8x128xf32>
    %3 = tpu.matmul %1, %2, %cst {dimension_numbers = #tpu.dot_dimension_numbers<[1], [0], [0], [1], [0, 0, 1, 1], [], []>} : vector<8x784xbf16>, vector<784x128xbf16>, vector<8x128xf32> -> vector<8x128xf32>
    %c0_3 = arith.constant 0 : index
    %c0_4 = arith.constant 0 : index
    %4 = vector.load %arg3[%c0_3, %c0_4] : memref<1x128xf32, #tpu.memory_space<vmem>>, vector<1x128xf32>
    %5 = vector.broadcast %4 : vector<1x128xf32> to vector<8x128xf32>
    %6 = arith.addf %3, %5 : vector<8x128xf32>
    %cst_5 = arith.constant 0.000000e+00 : f32
    %7 = vector.broadcast %cst_5 : f32 to vector<8x128xf32>
    %8 = arith.maximumf %6, %7 : vector<8x128xf32>
    %9 = arith.truncf %8 : vector<8x128xf32> to vector<8x128xbf16>
    %c0_6 = arith.constant 0 : index
    %c0_7 = arith.constant 0 : index
    %10 = vector.load %arg4[%c0_6, %c0_7] : memref<128x128xbf16, #tpu.memory_space<vmem>>, vector<128x128xbf16>
    %cst_8 = arith.constant dense<0.000000e+00> : vector<8x128xf32>
    %11 = tpu.matmul %9, %10, %cst_8 {dimension_numbers = #tpu.dot_dimension_numbers<[1], [0], [0], [1], [0, 0, 1, 1], [], []>} : vector<8x128xbf16>, vector<128x128xbf16>, vector<8x128xf32> -> vector<8x128xf32>
    %c0_9 = arith.constant 0 : index
    %c0_10 = arith.constant 0 : index
    %12 = vector.load %arg5[%c0_9, %c0_10] : memref<1x128xf32, #tpu.memory_space<vmem>>, vector<1x128xf32>
    %13 = vector.broadcast %12 : vector<1x128xf32> to vector<8x128xf32>
    %14 = arith.addf %11, %13 : vector<8x128xf32>
    %cst_11 = arith.constant 0.000000e+00 : f32
    %15 = vector.broadcast %cst_11 : f32 to vector<8x128xf32>
    %16 = arith.maximumf %14, %15 : vector<8x128xf32>
    %17 = arith.truncf %16 : vector<8x128xf32> to vector<8x128xbf16>
    %c0_12 = arith.constant 0 : index
    %c0_13 = arith.constant 0 : index
    %18 = vector.load %arg6[%c0_12, %c0_13] : memref<128x128xbf16, #tpu.memory_space<vmem>>, vector<128x128xbf16>
    %cst_14 = arith.constant dense<0.000000e+00> : vector<8x128xf32>
    %19 = tpu.matmul %17, %18, %cst_14 {dimension_numbers = #tpu.dot_dimension_numbers<[1], [0], [0], [1], [0, 0, 1, 1], [], []>} : vector<8x128xbf16>, vector<128x128xbf16>, vector<8x128xf32> -> vector<8x128xf32>
    %c0_15 = arith.constant 0 : index
    %c0_16 = arith.constant 0 : index
    %20 = vector.load %arg7[%c0_15, %c0_16] : memref<1x128xf32, #tpu.memory_space<vmem>>, vector<1x128xf32>
    %21 = vector.broadcast %20 : vector<1x128xf32> to vector<8x128xf32>
    %22 = arith.addf %19, %21 : vector<8x128xf32>
    %23 = tpu.iota {dimensions = array<i32: 1>} : vector<8x128xi32>
    %c10_i32 = arith.constant 10 : i32
    %24 = vector.broadcast %c10_i32 : i32 to vector<8x128xi32>
    %25 = arith.cmpi slt, %23, %24 : vector<8x128xi32>
    %cst_17 = arith.constant -1.000000e+30 : f32
    %26 = vector.broadcast %cst_17 : f32 to vector<8x128xf32>
    %27 = arith.select %25, %22, %26 : vector<8x128xi1>, vector<8x128xf32>
    %cst_18 = arith.constant dense<0xFF800000> : vector<8xf32>
    %28 = vector.multi_reduction <maximumf>, %27, %cst_18 [1] : vector<8x128xf32> to vector<8xf32>
    %29 = vector.shape_cast %28 : vector<8xf32> to vector<8x1xf32>
    %30 = vector.broadcast %29 : vector<8x1xf32> to vector<8x128xf32>
    %31 = arith.subf %27, %30 : vector<8x128xf32>
    %32 = math.exp %31 : vector<8x128xf32>
    %cst_19 = arith.constant dense<0.000000e+00> : vector<8xf32>
    %33 = vector.multi_reduction <add>, %32, %cst_19 [1] : vector<8x128xf32> to vector<8xf32>
    %34 = vector.shape_cast %33 : vector<8xf32> to vector<8x1xf32>
    %35 = math.log %34 : vector<8x1xf32>
    %36 = vector.broadcast %35 : vector<8x1xf32> to vector<8x128xf32>
    %37 = arith.subf %31, %36 : vector<8x128xf32>
    %38 = arith.truncf %37 : vector<8x128xf32> to vector<8x128xbf16>
    %c0_20 = arith.constant 0 : index
    %c0_21 = arith.constant 0 : index
    %39 = vector.load %arg8[%c0_20, %c0_21] : memref<8x128xbf16, #tpu.memory_space<vmem>>, vector<8x128xbf16>
    tpu.vector_store %arg8[%c0_20, %c0_21], %38 {strides = array<i32>} : memref<8x128xbf16, #tpu.memory_space<vmem>>, vector<8x128xbf16>,
    return
  }
  func.func @transform_0(%arg0: i32) -> (i32, i32) {
    %c0_i32 = arith.constant 0 : i32
    %c0_i32_0 = arith.constant 0 : i32
    return %arg0, %c0_i32 : i32, i32
  }
  func.func @transform_1(%arg0: i32) -> (i32, i32) {
    %c0_i32 = arith.constant 0 : i32
    %c0_i32_0 = arith.constant 0 : i32
    %c0_i32_1 = arith.constant 0 : i32
    return %c0_i32, %c0_i32_0 : i32, i32
  }
  func.func @transform_2(%arg0: i32) -> (i32, i32) {
    %c0_i32 = arith.constant 0 : i32
    %c0_i32_0 = arith.constant 0 : i32
    %c0_i32_1 = arith.constant 0 : i32
    return %c0_i32, %c0_i32_0 : i32, i32
  }
  func.func @transform_3(%arg0: i32) -> (i32, i32) {
    %c0_i32 = arith.constant 0 : i32
    %c0_i32_0 = arith.constant 0 : i32
    %c0_i32_1 = arith.constant 0 : i32
    return %c0_i32, %c0_i32_0 : i32, i32
  }
  func.func @transform_4(%arg0: i32) -> (i32, i32) {
    %c0_i32 = arith.constant 0 : i32
    %c0_i32_0 = arith.constant 0 : i32
    %c0_i32_1 = arith.constant 0 : i32
    return %c0_i32, %c0_i32_0 : i32, i32
  }
  func.func @transform_5(%arg0: i32) -> (i32, i32) {
    %c0_i32 = arith.constant 0 : i32
    %c0_i32_0 = arith.constant 0 : i32
    %c0_i32_1 = arith.constant 0 : i32
    return %c0_i32, %c0_i32_0 : i32, i32
  }
  func.func @transform_6(%arg0: i32) -> (i32, i32) {
    %c0_i32 = arith.constant 0 : i32
    %c0_i32_0 = arith.constant 0 : i32
    %c0_i32_1 = arith.constant 0 : i32
    return %c0_i32, %c0_i32_0 : i32, i32
  }
  func.func @transform_7(%arg0: i32) -> (i32, i32) {
    %c0_i32 = arith.constant 0 : i32
    %c0_i32_0 = arith.constant 0 : i32
    return %arg0, %c0_i32 : i32, i32
  }
}

</mosaic_0001>

<bundles_post_ra>
// kernel: tpu_custom_call.1
= control target key start
LH: loop header
LB: loop body
LE: loop exit
PB: predicated region body
PF: predicated region fallthrough
CT: control target
= control target key end

     0   :  { %12 = vsyncpa [#allocation3], 0  ;;  %s1334_s0 = inlined_call_operand.hbm [shape: f32[8,784], index: 0, kind: input, shape index: {}]   ;;  %s1335_s1 = inlined_call_operand.hbm [shape: bf16[784,128], index: 1, kind: input, shape index: {}]   ;;  %s1336_s2 = inlined_call_operand.vmem [shape: f32[1,128], index: 2, kind: input, shape index: {}]   ;;  %s1337_s3 = inlined_call_operand.hbm [shape: bf16[128,128], index: 3, kind: input, shape index: {}]   ;;  %s1338_s4 = inlined_call_operand.vmem [shape: f32[1,128], index: 4, kind: input, shape index: {}]   ;;  %s1339_s5 = inlined_call_operand.hbm [shape: bf16[128,128], index: 5, kind: input, shape index: {}]   ;;  %s1340_s6 = inlined_call_operand.vmem [shape: f32[1,128], index: 6, kind: input, shape index: {}]   ;;  %s1341_s7 = inlined_call_operand.hbm [shape: bf16[8,128], index: 7, kind: output, shape index: {}]  }
   0x1   :  { %13 = vsyncpa [#allocation6], 0 }
   0x2   :  { %14 = vsyncpa [#allocation9], 0  ;;  %s31_s26 = sshll.u32 %s1335_s1, 4  ;;  %s32_s26 = int_to_ptr.hbm [resolvable:$true] %s31_s26 }
   0x3   :  { %15 = vsyncpa [#allocation4], 0  ;;  %s1263_s27 = smov [#allocation5]   ;;  %s21_s8 = sshll.u32 %s1334_s0, 4  ;;  %s22_s8 = int_to_ptr.hbm [resolvable:$true] %s21_s8 }
   0x4   :  { %s33_s28 = sshll.u32 %s1263_s27, 4  ;;  %s1264_s9 = smov 64   ;;  %s34_s28 = int_to_ptr.vmem [resolvable:$true] %s33_s28 }
   0x5   :  { %s1265_s10 = smov 4   ;;  %s1266_s11 = smov [#allocation2]  }
   0x6   :  { %39 = dma.hbm_to_vmem [thread:$0]  %s32_s26, 6272, %s34_s28, [#allocation6], %s1264_s9, %s1264_s9, %s1265_s10  }
   0x7   :  { %s23_s12 = sshll.u32 %s1266_s11, 4  ;;  %s46_s15 = sshll.u32 %s1337_s3, 4  ;;  %s24_s12 = int_to_ptr.vmem [resolvable:$true] %s23_s12  ;;  %s47_s15 = int_to_ptr.hbm [resolvable:$true] %s46_s15 }
   0x8   :  { %26 = dma.hbm_to_vmem [thread:$0]  %s22_s8, 896, %s24_s12, [#allocation3]  }
   0x9   :  { %s61_s17 = sshll.u32 %s1339_s5, 4  ;;  %s1267_s18 = smov [#allocation7]   ;;  %s62_s17 = int_to_ptr.hbm [resolvable:$true] %s61_s17 }
   0xa   :  { %s48_s19 = sshll.u32 %s1267_s18, 4  ;;  %s1268_s0 = smov [#allocation8]   ;;  %s49_s19 = int_to_ptr.vmem [resolvable:$true] %s48_s19 }
   0xb   :  { %54 = dma.hbm_to_vmem [thread:$0]  %s47_s15, 1024, %s49_s19, [#allocation6], %s1264_s9, %s1264_s9, %s1265_s10  }
   0xc   :  { %s63_s20 = sshll.u32 %s1268_s0, 4  ;;  %s64_s20 = int_to_ptr.vmem [resolvable:$true] %s63_s20 }
   0xd   :  { %69 = dma.hbm_to_vmem [thread:$0]  %s62_s17, 1024, %s64_s20, [#allocation9], %s1264_s9, %s1264_s9, %s1265_s10  }
   0xe   :  { %1255 = dma.done.wait [#allocation3], 896  }
   0xf   :  { %1256 = vsyncadd [#allocation3], 4294966400 }
  0x10   :  { %1257 = dma.done.wait [#allocation6], 7296  }
  0x11   :  { %1258 = vsyncadd [#allocation6], 4294960000 }
  0x12   :  { %1259 = dma.done.wait [#allocation9], 1024  }
  0x13   :  { %1260 = vsyncadd [#allocation9], 4294966272  ;;  %v1063_v0 = vld [vmem:[#allocation5 + $0x38] sm:$0xff]  ;;  %v1062_v3 = vld [vmem:[#allocation5 + $0x30] sm:$0xff]  ;;  %vm499_vm0 = vcmask 130048   ;;  %s783_s26 = sshll.u32 %s1341_s7, 4  ;;  %s784_s26 = int_to_ptr.hbm [resolvable:$true] %s783_s26 }
  0x14   :  { %v1071_v1 = vld [vmem:[#allocation5 + $0x78] sm:$0xff]  ;;  %503 = vmatpush.bf16.msra.mxu0 %v1063_v0  ;;  %v1070_v4 = vld [vmem:[#allocation5 + $0x70] sm:$0xff]  ;;  %v1061_v8 = vld [vmem:[#allocation5 + $0x28] sm:$0xff] }
  0x15   :  { %v1079_v2 = vld [vmem:[#allocation5 + $0xb8] sm:$0xff]  ;;  %516 = vmatpush.bf16.msra.mxu1 %v1071_v1  ;;  %v1078_v5 = vld [vmem:[#allocation5 + $0xb0] sm:$0xff]  ;;  %v1069_v9 = vld [vmem:[#allocation5 + $0x68] sm:$0xff] }
  0x16   :  { %529 = vmatpush.bf16.msra.mxu2 %v1079_v2  ;;  %v1087_v6 = vld [vmem:[#allocation5 + $0xf8] sm:$0xff]  ;;  %v1086_v7 = vld [vmem:[#allocation5 + $0xf0] sm:$0xff]  ;;  %v1077_v10 = vld [vmem:[#allocation5 + $0xa8] sm:$0xff] }
  0x17   :  { %542 = vmatpush.bf16.msra.mxu3 %v1087_v6  ;;  %v1085_v11 = vld [vmem:[#allocation5 + $0xe8] sm:$0xff]  ;;  %v1060_v12 = vld [vmem:[#allocation5 + $0x20] sm:$0xff]  ;;  %v1059_v16 = vld [vmem:[#allocation5 + $0x18] sm:$0xff] }
  0x18   :  { %504 = vmatpush.bf16.msra.mxu0 %v1062_v3  ;;  %v1068_v13 = vld [vmem:[#allocation5 + $0x60] sm:$0xff]  ;;  %v1067_v17 = vld [vmem:[#allocation5 + $0x58] sm:$0xff]  ;;  %v1058_v20 = vld [vmem:[#allocation5 + $0x10] sm:$0xff] }
  0x19   :  { %517 = vmatpush.bf16.msra.mxu1 %v1070_v4  ;;  %v1076_v14 = vld [vmem:[#allocation5 + $0xa0] sm:$0xff]  ;;  %v1075_v18 = vld [vmem:[#allocation5 + $0x98] sm:$0xff]  ;;  %v1066_v21 = vld [vmem:[#allocation5 + $0x50] sm:$0xff] }
  0x1a   :  { %530 = vmatpush.bf16.msra.mxu2 %v1078_v5  ;;  %v1084_v15 = vld [vmem:[#allocation5 + $0xe0] sm:$0xff]  ;;  %v1083_v19 = vld [vmem:[#allocation5 + $0xd8] sm:$0xff]  ;;  %v1074_v22 = vld [vmem:[#allocation5 + $0x90] sm:$0xff] }
  0x1b   :  { %543 = vmatpush.bf16.msra.mxu3 %v1086_v7  ;;  %v1082_v23 = vld [vmem:[#allocation5 + $0xd0] sm:$0xff]  ;;  %v1057_v24 = vld [vmem:[#allocation5 + $0x8] sm:$0xff]  ;;  %v1056_v27 = vld [vmem:[#allocation5] sm:$0xff] }
  0x1c   :  { %505 = vmatpush.bf16.msra.mxu0 %v1061_v8  ;;  %v1065_v25 = vld [vmem:[#allocation5 + $0x48] sm:$0xff]  ;;  %v1064_v29 = vld [vmem:[#allocation5 + $0x40] sm:$0xff]  ;;  %v90_v31 = vld [vmem:[#allocation2 + $0x8] sm:$0xff] }
  0x1d   :  { %518 = vmatpush.bf16.msra.mxu1 %v1069_v9  ;;  %v1073_v26 = vld [vmem:[#allocation5 + $0x88] sm:$0xff]  ;;  %v1095_v32 = vld [vmem:[#allocation5 + $0x138] sm:$0xff]  ;;  %v1072_v34 = vld [vmem:[#allocation5 + $0x80] sm:$0xff]  ;;  %v97_v37 = vpack.c.bf16 %v90_v31, %v90_v31 }
  0x1e   :  { %531 = vmatpush.bf16.msra.mxu2 %v1077_v10  ;;  %v1081_v28 = vld [vmem:[#allocation5 + $0xc8] sm:$0xff]  ;;  %v1103_v33 = vld [vmem:[#allocation5 + $0x178] sm:$0xff]  ;;  %v1080_v38 = vld [vmem:[#allocation5 + $0xc0] sm:$0xff] }
  0x1f   :  { %544 = vmatpush.bf16.msra.mxu3 %v1085_v11  ;;  %v89_v30 = vld [vmem:[#allocation2] sm:$0xff]  ;;  %v91_v35 = vld [vmem:[#allocation2 + $0x10] sm:$0xff]  ;;  %v1104_v39 = vld [vmem:[#allocation5 + $0x180] sm:$0xff] }
  0x20   :  { %506 = vmatpush.bf16.msra.mxu0 %v1060_v12  ;;  %v96_v36 = vpack.c.bf16 %v89_v30, %v89_v30  ;;  %v92_v40 = vld [vmem:[#allocation2 + $0x18] sm:$0xff]  ;;  %v1094_v41 = vld [vmem:[#allocation5 + $0x130] sm:$0xff]  ;;  %v98_v43 = vpack.c.bf16 %v91_v35, %v91_v35  ;;  %v1093_v45 = vld [vmem:[#allocation5 + $0x128] sm:$0xff] }
  0x21   :  { %519 = vmatpush.bf16.msra.mxu1 %v1068_v13  ;;  %v1102_v42 = vld [vmem:[#allocation5 + $0x170] sm:$0xff]  ;;  %v99_v44 = vpack.c.bf16 %v92_v40, %v92_v40  ;;  %v1101_v46 = vld [vmem:[#allocation5 + $0x168] sm:$0xff]  ;;  %v1092_v47 = vld [vmem:[#allocation5 + $0x120] sm:$0xff] }
  0x22   :  { %532 = vmatpush.bf16.msra.mxu2 %v1076_v14  ;;  %v1100_v48 = vld [vmem:[#allocation5 + $0x160] sm:$0xff]  ;;  %v1091_v49 = vld [vmem:[#allocation5 + $0x118] sm:$0xff]  ;;  %v1090_v52 = vld [vmem:[#allocation5 + $0x110] sm:$0xff] }
  0x23   :  { %545 = vmatpush.bf16.msra.mxu3 %v1084_v15  ;;  %v1099_v50 = vld [vmem:[#allocation5 + $0x158] sm:$0xff]  ;;  %v1098_v53 = vld [vmem:[#allocation5 + $0x150] sm:$0xff]  ;;  %v1089_v55 = vld [vmem:[#allocation5 + $0x108] sm:$0xff] }
  0x24   :  { %507 = vmatpush.bf16.msra.mxu0 %v1059_v16  ;;  %v95_v51 = vld [vmem:[#allocation2 + $0x30] sm:$0xff]  ;;  %v1097_v56 = vld [vmem:[#allocation5 + $0x148] sm:$0xff]  ;;  %v1088_v57 = vld [vmem:[#allocation5 + $0x100] sm:$0xff] }
  0x25   :  { %520 = vmatpush.bf16.msra.mxu1 %v1067_v17  ;;  %v102_v54 = vpack.c.bf16 %v95_v51, %v95_v51  ;;  %v1096_v58 = vld [vmem:[#allocation5 + $0x140] sm:$0xff]  ;;  %v93_v59 = vld [vmem:[#allocation2 + $0x20] sm:$0xff]  ;;  %v94_v60 = vld [vmem:[#allocation2 + $0x28] sm:$0xff] }
  0x26   :  { %533 = vmatpush.bf16.msra.mxu2 %v1075_v18  ;;  %v100_v61 = vpack.c.bf16 %v93_v59, %v93_v59  ;;  %v101_v62 = vpack.c.bf16 %v94_v60, %v94_v60  ;;  %v1112_v63 = vld [vmem:[#allocation7 + $0x38] sm:$0xff]  ;;  %v1111_v0 = vld [vmem:[#allocation7 + $0x30] sm:$0xff]  ;;  %v1110_v1 = vld [vmem:[#allocation7 + $0x28] sm:$0xff] }
  0x27   :  { %546 = vmatpush.bf16.msra.mxu3 %v1083_v19  ;;  %v1109_v2 = vld [vmem:[#allocation7 + $0x20] sm:$0xff]  ;;  %v1108_v3 = vld [vmem:[#allocation7 + $0x18] sm:$0xff]  ;;  %v1107_v4 = vld [vmem:[#allocation7 + $0x10] sm:$0xff] }
  0x28   :  { %508 = vmatpush.bf16.msra.mxu0 %v1058_v20  ;;  %v1106_v5 = vld [vmem:[#allocation7 + $0x8] sm:$0xff]  ;;  %v1105_v8 = vld [vmem:[#allocation7] sm:$0xff]  ;;  %v1120_v11 = vld [vmem:[#allocation8 + $0x38] sm:$0xff] }
  0x29   :  { %521 = vmatpush.bf16.msra.mxu1 %v1066_v21  ;;  %v1119_v14 = vld [vmem:[#allocation8 + $0x30] sm:$0xff]  ;;  %v1128_v15 = vld [vmem:[%s1336_s2] ss:$0 sm:$0xff]  ;;  %v1118_v16 = vld [vmem:[#allocation8 + $0x28] sm:$0xff] }
  0x2a   :  { %534 = vmatpush.bf16.msra.mxu2 %v1074_v22  ;;  %v1117_v20 = vld [vmem:[#allocation8 + $0x20] sm:$0xff]  ;;  %v1116_v22 = vld [vmem:[#allocation8 + $0x18] sm:$0xff] }
  0x2b   :  { %547 = vmatpush.bf16.msra.mxu3 %v1082_v23 }
  0x2c   :  { %509 = vmatpush.bf16.msra.mxu0 %v1057_v24 }
  0x2d   :  { %522 = vmatpush.bf16.msra.mxu1 %v1065_v25  ;;  %v1115_v25 = vld [vmem:[#allocation8 + $0x10] sm:$0xff] }
  0x2e   :  { %535 = vmatpush.bf16.msra.mxu2 %v1073_v26 }
  0x2f   :  { %548 = vmatpush.bf16.msra.mxu3 %v1081_v28 }
  0x30   :  { %510 = vmatpush.bf16.msra.mxu0 %v1056_v27 }
  0x31   :  { %523 = vmatpush.bf16.msra.mxu1 %v1064_v29 }
  0x32   :  { %536 = vmatpush.bf16.msra.mxu2 %v1072_v34 }
  0x33   :  { %511 = vmatmul.bf16.vlgmr.msra.gmra.mxu0 %v96_v36  ;;  %549 = vmatpush.bf16.msra.mxu3 %v1080_v38  ;;  %v1113_v38 = vld [vmem:[#allocation8] sm:$0xff] }
  0x34   :  { %555 = vmatpush.bf16.msrb.mxu0 %v1095_v32  ;;  %524 = vmatmul.bf16.vlgmr.msra.gmra.mxu1 %v97_v37  ;;  %v1114_v37 = vld [vmem:[#allocation8 + $0x8] sm:$0xff] }
  0x35   :  { %568 = vmatpush.bf16.msrb.mxu1 %v1103_v33  ;;  %537 = vmatmul.bf16.vlgmr.msra.gmra.mxu2 %v98_v43 }
  0x36   :  { %588 = vmatpush.bf16.msrb.mxu2 %v1104_v39  ;;  %550 = vmatmul.bf16.vlgmr.msra.gmra.mxu3 %v99_v44  ;;  %v1129_v39 = vld [vmem:[%s1338_s4] ss:$0 sm:$0xff]  ;;  %s1269_s4 = smov [#allocation10]  }
  0x37   :  { %664 = vmatpush.bf16.msrb.mxu3 %v1112_v63  ;;  %s781_s24 = sshll.u32 %s1269_s4, 4  ;;  %s782_s24 = int_to_ptr.vmem [resolvable:$true] %s781_s24 }
  0x38   :  { %556 = vmatpush.bf16.msrb.mxu0 %v1094_v41 }
  0x39   :  { %569 = vmatpush.bf16.msrb.mxu1 %v1102_v42 }
  0x3a   :  { %747 = vmatpush.bf16.msra.mxu2 %v1120_v11 }
  0x3b   :  { %665 = vmatpush.bf16.msrb.mxu3 %v1111_v0 }
  0x3c   :  { %557 = vmatpush.bf16.msrb.mxu0 %v1093_v45  ;;  %v760_v45 = vlaneseq }
  0x3d   :  { %570 = vmatpush.bf16.msrb.mxu1 %v1101_v46 }
  0x3e   :  { %748 = vmatpush.bf16.msra.mxu2 %v1119_v14  ;;  %v761_v46 = vand.u32 127, %v760_v45 }
  0x3f   :  { %666 = vmatpush.bf16.msrb.mxu3 %v1110_v1 }
  0x40   :  { %558 = vmatpush.bf16.msrb.mxu0 %v1092_v47  ;;  %v1130_v47 = vld [vmem:[%s1340_s6] ss:$0 sm:$0xff]  ;;  %vm762_vm1 = vcmp.lt.s32.totalorder %v761_v46, 10 }
  0x41   :  { %571 = vmatpush.bf16.msrb.mxu1 %v1100_v48 }
  0x42   :  { %749 = vmatpush.bf16.msra.mxu2 %v1118_v16 }
  0x43   :  { %667 = vmatpush.bf16.msrb.mxu3 %v1109_v2 }
  0x44   :  { %559 = vmatpush.bf16.msrb.mxu0 %v1091_v49 }
  0x45   :  { %572 = vmatpush.bf16.msrb.mxu1 %v1099_v50  ;;  %991 = vmatmul.msk.bf16.vlgmr.msrb.gmra.mxu2 %vm499_vm0, %v102_v54 }
  0x46   :  { %750 = vmatpush.bf16.msra.mxu2 %v1117_v20 }
  0x47   :  { %668 = vmatpush.bf16.msrb.mxu3 %v1108_v3 }
  0x48   :  { %560 = vmatpush.bf16.msrb.mxu0 %v1090_v52 }
  0x49   :  { %573 = vmatpush.bf16.msrb.mxu1 %v1098_v53 }
  0x4a   :  { %751 = vmatpush.bf16.msra.mxu2 %v1116_v22 }
  0x4b   :  { %669 = vmatpush.bf16.msrb.mxu3 %v1107_v4 }
  0x4c   :  { %561 = vmatpush.bf16.msrb.mxu0 %v1089_v55 }
  0x4d   :  { %574 = vmatpush.bf16.msrb.mxu1 %v1097_v56 }
  0x4e   :  { %752 = vmatpush.bf16.msra.mxu2 %v1115_v25 }
  0x4f   :  { %670 = vmatpush.bf16.msrb.mxu3 %v1106_v5 }
  0x50   :  { %562 = vmatpush.bf16.msrb.mxu0 %v1088_v57 }
  0x51   :  { %575 = vmatpush.bf16.msrb.mxu1 %v1096_v58 }
  0x52   :  { %753 = vmatpush.bf16.msra.mxu2 %v1114_v37 }
  0x53   :  { %563 = vmatmul.bf16.vlgmr.msrb.gmra.mxu0 %v100_v61  ;;  %671 = vmatpush.bf16.msrb.mxu3 %v1105_v8 }
  0x54   :  { %576 = vmatmul.bf16.vlgmr.msrb.gmra.mxu1 %v101_v62 }
  0x56   :  { %754 = vmatpush.bf16.msra.mxu2 %v1113_v38 }
  0xb0   :  { %v512_v6 = vpop.f32.mrf.mxu0 }
  0xb1   :  { %v525_v7 = vpop.f32.mrf.mxu1  ;;  %v513_v17 = vadd.f32 %v1128_v15, %v512_v6 }
  0xb3   :  { %v526_v21 = vadd.f32 %v525_v7, %v513_v17 }
  0xb8   :  { %v514_v9 = vpop.f32.mrf.mxu0  ;;  %v538_v12 = vpop.f32.mrf.mxu2 }
  0xb9   :  { %v527_v10 = vpop.f32.mrf.mxu1  ;;  %v551_v13 = vpop.f32.mrf.mxu3  ;;  %v539_v23 = vadd.f32 %v538_v12, %v526_v21 }
  0xbb   :  { %v552_v26 = vadd.f32 %v551_v13, %v539_v23 }
  0xc0   :  { %v540_v18 = vpop.f32.mrf.mxu2 }
  0xc1   :  { %v553_v19 = vpop.f32.mrf.mxu3 }
  0xc8   :  { %v590_v24 = vpop.f32.mrf.mxu2 }
  0xd0   :  { %v564_v27 = vpop.f32.mrf.mxu0  ;;  %v592_v31 = vpop.f32.mrf.mxu2 }
  0xd1   :  { %v577_v28 = vpop.f32.mrf.mxu1  ;;  %v565_v29 = vadd.f32 %v564_v27, %v552_v26 }
  0xd3   :  { %v578_v30 = vadd.f32 %v577_v28, %v565_v29 }
  0xd5   :  { %v591_v32 = vadd.f32 %v590_v24, %v578_v30 }
  0xd7   :  { %v594_v33 = vmax.f32 %v591_v32, 0.0 }
  0xd8   :  { %v566_v34 = vpop.f32.mrf.mxu0 }
  0xd9   :  { %v579_v35 = vpop.f32.mrf.mxu1  ;;  %v595_v36 = vpack.c.bf16 %v594_v33, %v594_v33 }
  0xdb   :  { %672 = vmatmul.bf16.vlgmr.msrb.gmra.mxu3 %v595_v36 }
 0x15e   :  { %v673_v40 = vpop.f32.mrf.mxu3 }
 0x15f   :  { %v674_v41 = vadd.f32 %v1129_v39, %v673_v40 }
 0x161   :  { %v677_v42 = vmax.f32 %v674_v41, 0.0 }
 0x163   :  { %v678_v43 = vpack.c.bf16 %v677_v42, %v677_v42 }
 0x165   :  { %755 = vmatmul.bf16.vlgmr.msra.gmra.mxu2 %v678_v43 }
 0x166   :  { %v675_v44 = vpop.f32.mrf.mxu3 }
 0x1e8   :  { %v756_v48 = vpop.f32.mrf.mxu2 }
 0x1e9   :  { %v757_v49 = vadd.f32 %v1130_v47, %v756_v48 }
 0x1eb   :  { %v763_v50 = vsel %vm762_vm1, %v757_v49, -1e+30 }
 0x1ec   :  { %764 = vmax.xlane.f32.xlu0 %v763_v50 }
 0x1f0   :  { %v758_v51 = vpop.f32.mrf.mxu2 }
 0x25f   :  { %v765_v52 = vpop.xlane.xlu0 %764 }
 0x260   :  { %v766_v53 = vsub.f32 %v763_v50, %v765_v52 }
 0x262   :  { %v767_v54 = vmul.f32 1.442695, %v766_v53 }
 0x264   :  { %1131 = vpow2.f32 %v767_v54 }
 0x26a   :  { %v1132_v55 = vpop.eup %1131 }
 0x26b   :  { %769 = vadd.xlane.f32.xlu0 %v1132_v55 }
 0x2de   :  { %v770_v56 = vpop.xlane.xlu0 %769 }
 0x2df   :  { %1133 = vlog2.f32 %v770_v56 }
 0x2e5   :  { %v1134_v57 = vpop.eup %1133 }
 0x2e6   :  { %v772_v58 = vmul.f32 0.6931472, %v1134_v57 }
 0x2e8   :  { %v773_v59 = vsub.f32 %v766_v53, %v772_v58 }
 0x2ea   :  { %v774_v60 = vpack.c.bf16 %v773_v59, %v773_v59 }
 0x2ec   :  { %775 = vst [vmem:[#allocation10] sm:$0xf] %v774_v60 }
 0x2ed   :  { %786 = dma.vmem_to_hbm [thread:$0]  %s782_s24, 64, %s784_s26, [#allocation4]  }
 0x2ee   :  { %1261 = dma.done.wait [#allocation4], 64  }
 0x2ef   :  { %1262 = vsyncadd [#allocation4], 4294967232 }
 0x2f0   :  { %791 = vsyncpa [#allocation3], 1 }
 0x2f1   :  { %792 = vsyncpa [#allocation6], 1 }
 0x2f2   :  { %793 = vsyncpa [#allocation9], 1 }
 0x2f3   :  { %794 = vsyncpa [#allocation4], 1 }

</bundles_post_ra>
